<compile_context>
chip_gen: v5e
topology: v5e:2x2
jax: 0.10.0
libtpu: 0.0.40
codegen_flags: <defaults>
</compile_context>

<pallas_src>
import functools

import jax
import jax.numpy as jnp
import numpy as np
from jax.experimental import pallas as pl
from jax.experimental.pallas import tpu as pltpu


def _round_up(a, b):
    return ((a + b - 1) // b) * b


def _tpu_vmem_and_num_cores():
    """Best-effort per-TensorCore VMEM capacity and TC count (perf heuristics only)."""
    vmem_cap = 64 * 1024 * 1024          # conservative default (v7x per-TC VMEM)
    try:
        info = pltpu.get_tpu_info()
        vmem_cap = int(getattr(info, "vmem_capacity_bytes", vmem_cap))
    except Exception:
        pass
    # 64 MiB-per-core parts (v7x) have 2 TensorCores per chip; 128 MiB parts
    # (v5e / v6e) have a single TensorCore.
    num_cores = 2 if vmem_cap <= 64 * 1024 * 1024 else 1
    return vmem_cap, num_cores


def _tbe_kernel(coef_small_ref, coef_large_ref, x_ref, o_ref, xp_ref, *,
                window_size, pad_left, length):
    """One row-tile: sliding-window mean + coefficient select.

    coef_* : (1,) f32 in SMEM.
    x_ref  : (TR, L)  input tile (native dtype).
    o_ref  : (TR, L)  output tile.
    xp_ref : (TR, Lp) f32 scratch, Lp >= L + W - 1 (halo buffer, zero tail).
    """
    W = window_size
    P = pad_left
    L = length
    Lp = xp_ref.shape[-1]

    x = x_ref[...].astype(jnp.float32)                       # (TR, L)

    # Stage the tile into the halo scratch: data at [0, L), zeros at [L, Lp).
    # The zero region is rewritten every step (a "parallel" grid may start a core at
    # program_id > 0, so we cannot rely on a one-time init); it is only ~W+128 lanes
    # wide.  L0 keeps both stores lane-aligned at their start.
    L0 = (L // 128) * 128
    if L0 < Lp:
        xp_ref[:, L0:] = jnp.zeros((xp_ref.shape[0], Lp - L0), jnp.float32)
    xp_ref[:, :L] = x
    y = xp_ref[...]                                           # (TR, Lp), f32

    # moving_sum[i] = sum_{k<W} y[(i - P + k) mod Lp].  Since Lp >= L + W - 1 and
    # y[L:Lp) == 0, for every output position i < L the wrapped indices land in the
    # zero tail, so this equals the zero-padded (non-circular) window sum used by
    # F.conv1d(padding=W//2).  Built with log-depth doubling: O(log W) XLU rolls.
    acc = None
    cur = y                                                   # circular sum of width m
    m = 1
    offset = -P                                               # window starts at x[i - P]
    rem = W
    while rem:
        if rem & 1:
            s = (-offset) % Lp
            contrib = cur if s == 0 else pltpu.roll(cur, shift=s, axis=1)
            acc = contrib if acc is None else acc + contrib
            offset += m
        rem >>= 1
        if rem:
            cur = cur + pltpu.roll(cur, shift=Lp - m, axis=1)
            m *= 2

    moving_avg = acc[:, :L] * (1.0 / W)
    cs = coef_small_ref[0]
    cl = coef_large_ref[0]
    o_ref[...] = jnp.where(x > moving_avg, x * cs, x * cl).astype(o_ref.dtype)


def temporal_background_equalizer(x, coef_small, coef_large, window_size, *,
                                  max_row_tile=1024):
    """x: (B, C, L); coef_*: (1,).  Returns (B, C, L) in x.dtype."""
    B, C, L = x.shape
    W = int(window_size)
    P = W // 2
    R = B * C
    itemsize = jnp.dtype(x.dtype).itemsize

    # Halo scratch width (lane-dense).
    Lp = _round_up(L + W - 1, 128)

    vmem_cap, num_cores = _tpu_vmem_and_num_cores()
    # Resident-block budget: <= 48 MiB and <= ~2/3 of per-core VMEM.
    budget = min(48 * 1024 * 1024, (vmem_cap * 2) // 3)

    # Per-row VMEM estimate: double-buffered in/out blocks (native dtype), the f32
    # halo scratch, and ~4 live f32 temporaries of scratch width during the doubling.
    per_row = 4 * L * itemsize + 8 * L + 20 * Lp
    row_tile = budget // max(per_row, 1)
    row_tile = max(8, min(max_row_tile, (row_tile // 8) * 8))
    row_tile = min(row_tile, _round_up(R, 8))
    # TODO(synk): add a halo-overlapped L-axis grid dimension for extremely long
    # sequences where even an 8-row tile exceeds the VMEM budget.

    if num_cores >= 2 and R > row_tile:
        # Keep the grid step count even (and >= 2) so rows shard evenly across TCs.
        steps = -(-R // row_tile)
        if steps % 2 == 1:
            steps += 1
            row_tile = min(row_tile, max(8, _round_up(-(-R // steps), 8)))

    grid = (-(-R // row_tile),)

    # Derive the VMEM limit from the actual footprint (plus headroom), per generation.
    footprint = row_tile * per_row
    vmem_limit = int(min(vmem_cap, max(32 * 1024 * 1024, footprint + (16 << 20))))

    x2d = x.reshape(R, L)                                     # free reshape, no HBM copy
    cs = jnp.asarray(coef_small, jnp.float32).reshape(1)
    cl = jnp.asarray(coef_large, jnp.float32).reshape(1)

    kernel = functools.partial(_tbe_kernel, window_size=W, pad_left=P, length=L)
    out2d = pl.pallas_call(
        kernel,
        out_shape=jax.ShapeDtypeStruct((R, L), x.dtype),
        grid=grid,
        in_specs=[
            pl.BlockSpec(memory_space=pltpu.MemorySpace.SMEM),    # coef_small (1,)
            pl.BlockSpec(memory_space=pltpu.MemorySpace.SMEM),    # coef_large (1,)
            pl.BlockSpec((row_tile, L), lambda i: (i, 0)),        # x row tile
        ],
        out_specs=pl.BlockSpec((row_tile, L), lambda i: (i, 0)),
        scratch_shapes=[pltpu.VMEM((row_tile, Lp), jnp.float32)],
        compiler_params=pltpu.CompilerParams(
            dimension_semantics=("parallel",),
            vmem_limit_bytes=vmem_limit),
    )(cs, cl, x2d)

    return out2d.reshape(B, C, L)


def _reference(x, coef_small, coef_large, window_size):
    """Pure numpy reference mirroring the PyTorch forward exactly (odd & even W)."""
    x = np.asarray(x, dtype=np.float32)
    B, C, L = x.shape
    W = window_size
    P = W // 2
    xp = np.pad(x, ((0, 0), (0, 0), (P, P)))
    conv_len = L + 2 * P - W + 1
    mavg = np.zeros((B, C, L), dtype=np.float32)
    for i in range(min(L, conv_len)):
        mavg[..., i] = xp[..., i:i + W].sum(-1) / W
    cs = float(np.asarray(coef_small).reshape(-1)[0])
    cl = float(np.asarray(coef_large).reshape(-1)[0])
    return np.where(x > mavg, x * cs, x * cl)


if __name__ == "__main__":
    key = jax.random.PRNGKey(0)
    k_x, k_small, k_large = jax.random.split(key, 3)

    # Deterministic parameters mirroring torch.rand(1) / torch.rand(1) + 1.0
    coef_small = jax.random.uniform(k_small, (1,), dtype=jnp.float32)
    coef_large = jax.random.uniform(k_large, (1,), dtype=jnp.float32) + 1.0

    # (B, C, L, W): odd W, even W (torch crops the length-(L+1) conv output),
    # larger even W with L not a multiple of 128, and a case with rows not a
    # multiple of 8 / multi-vreg lane axis / multi-segment binary window.
    cases = [
        (2, 4, 16, 5),
        (2, 4, 16, 4),
        (2, 4, 72, 16),
        (3, 5, 200, 31),
    ]

    for B, C, L, W in cases:
        x = jax.random.normal(k_x, (B, C, L), dtype=jnp.float32)
        out = jax.block_until_ready(
            temporal_background_equalizer(x, coef_small, coef_large, W))
        ref = _reference(np.asarray(x), np.asarray(coef_small),
                         np.asarray(coef_large), W)
        np.testing.assert_allclose(np.asarray(out), ref, rtol=1e-5, atol=1e-5)

    print("KERNEL_OK")
</pallas_src>

<mosaic_0001>
module attributes {stable_mosaic.version = 11 : i64} {
  func.func @_tbe_kernel(%arg0: i32, %arg1: memref<1xf32, #tpu.memory_space<smem>>, %arg2: memref<1xf32, #tpu.memory_space<smem>>, %arg3: memref<8x16xf32, #tpu.memory_space<vmem>>, %arg4: memref<8x16xf32, #tpu.memory_space<vmem>>, %arg5: memref<8x128xf32, #tpu.memory_space<vmem>>) attributes {dimension_semantics = [#tpu.dimension_semantics<parallel>], iteration_bounds = array<i64: 1>, scalar_prefetch = 0 : i64, scratch_operands = 1 : i64, tpu.core_type = #tpu.core_type<tc>, window_params = [{transform_indices = @transform_0, window_bounds = array<i64: 1>}, {transform_indices = @transform_1, window_bounds = array<i64: 1>}, {transform_indices = @transform_2, window_bounds = array<i64: 8, 16>}, {transform_indices = @transform_3, window_bounds = array<i64: 8, 16>}]} {
    %c0 = arith.constant 0 : index
    %c0_0 = arith.constant 0 : index
    %0 = vector.load %arg3[%c0, %c0_0] : memref<8x16xf32, #tpu.memory_space<vmem>>, vector<8x16xf32>
    %cst = arith.constant 0.000000e+00 : f32
    %1 = vector.broadcast %cst : f32 to vector<8x128xf32>
    %c0_1 = arith.constant 0 : index
    %c0_2 = arith.constant 0 : index
    %2 = vector.load %arg5[%c0_1, %c0_2] : memref<8x128xf32, #tpu.memory_space<vmem>>, vector<8x128xf32>
    tpu.vector_store %arg5[%c0_1, %c0_2], %1 {strides = array<i32>} : memref<8x128xf32, #tpu.memory_space<vmem>>, vector<8x128xf32>,
    %c0_3 = arith.constant 0 : index
    %c0_4 = arith.constant 0 : index
    %3 = vector.load %arg5[%c0_3, %c0_4] : memref<8x128xf32, #tpu.memory_space<vmem>>, vector<8x16xf32>
    tpu.vector_store %arg5[%c0_3, %c0_4], %0 {strides = array<i32>} : memref<8x128xf32, #tpu.memory_space<vmem>>, vector<8x16xf32>,
    %c0_5 = arith.constant 0 : index
    %c0_6 = arith.constant 0 : index
    %4 = vector.load %arg5[%c0_5, %c0_6] : memref<8x128xf32, #tpu.memory_space<vmem>>, vector<8x128xf32>
    %c2_i32 = arith.constant 2 : i32
    %5 = tpu.dynamic_rotate %4 by %c2_i32 dim 1 : vector<8x128xf32>, i32 -> vector<8x128xf32>
    %c127_i32 = arith.constant 127 : i32
    %6 = tpu.dynamic_rotate %4 by %c127_i32 dim 1 : vector<8x128xf32>, i32 -> vector<8x128xf32>
    %7 = arith.addf %4, %6 : vector<8x128xf32>
    %c126_i32 = arith.constant 126 : i32
    %8 = tpu.dynamic_rotate %7 by %c126_i32 dim 1 : vector<8x128xf32>, i32 -> vector<8x128xf32>
    %9 = arith.addf %7, %8 : vector<8x128xf32>
    %c1_i32 = arith.constant 1 : i32
    %10 = tpu.dynamic_rotate %9 by %c1_i32 dim 1 : vector<8x128xf32>, i32 -> vector<8x128xf32>
    %11 = arith.addf %5, %10 : vector<8x128xf32>
    %12 = vector.extract_strided_slice %11 {offsets = [0, 0], sizes = [8, 16], strides = [1, 1]} : vector<8x128xf32> to vector<8x16xf32>
    %cst_7 = arith.constant 2.000000e-01 : f32
    %13 = vector.broadcast %cst_7 : f32 to vector<8x16xf32>
    %14 = arith.mulf %12, %13 : vector<8x16xf32>
    %c0_8 = arith.constant 0 : index
    %15 = memref.load %arg1[%c0_8] : memref<1xf32, #tpu.memory_space<smem>>
    %c0_9 = arith.constant 0 : index
    %16 = memref.load %arg2[%c0_9] : memref<1xf32, #tpu.memory_space<smem>>
    %17 = arith.cmpf ogt, %0, %14 : vector<8x16xf32>
    %18 = vector.broadcast %15 : f32 to vector<8x16xf32>
    %19 = arith.mulf %0, %18 : vector<8x16xf32>
    %20 = vector.broadcast %16 : f32 to vector<8x16xf32>
    %21 = arith.mulf %0, %20 : vector<8x16xf32>
    %22 = arith.select %17, %19, %21 : vector<8x16xi1>, vector<8x16xf32>
    %c0_10 = arith.constant 0 : index
    %c0_11 = arith.constant 0 : index
    %23 = vector.load %arg4[%c0_10, %c0_11] : memref<8x16xf32, #tpu.memory_space<vmem>>, vector<8x16xf32>
    tpu.vector_store %arg4[%c0_10, %c0_11], %22 {strides = array<i32>} : memref<8x16xf32, #tpu.memory_space<vmem>>, vector<8x16xf32>,
    return
  }
  func.func @transform_0(%arg0: i32) -> i32 {
    %c0_i32 = arith.constant 0 : i32
    %c0_i32_0 = arith.constant 0 : i32
    return %c0_i32 : i32
  }
  func.func @transform_1(%arg0: i32) -> i32 {
    %c0_i32 = arith.constant 0 : i32
    %c0_i32_0 = arith.constant 0 : i32
    return %c0_i32 : i32
  }
  func.func @transform_2(%arg0: i32) -> (i32, i32) {
    %c0_i32 = arith.constant 0 : i32
    %c0_i32_0 = arith.constant 0 : i32
    return %arg0, %c0_i32 : i32, i32
  }
  func.func @transform_3(%arg0: i32) -> (i32, i32) {
    %c0_i32 = arith.constant 0 : i32
    %c0_i32_0 = arith.constant 0 : i32
    return %arg0, %c0_i32 : i32, i32
  }
}

</mosaic_0001>

<bundles_post_ra>
// kernel: tpu_custom_call.1
= control target key start
LH: loop header
LB: loop body
LE: loop exit
PB: predicated region body
PF: predicated region fallthrough
CT: control target
= control target key end

     0   :  { %10 = vsyncpa [#allocation6], 0  ;;  %s174_s0 = inlined_call_operand.<no memory space> [shape: f32[1], index: 0, kind: input, shape index: {}]   ;;  %s175_s1 = inlined_call_operand.<no memory space> [shape: f32[1], index: 1, kind: input, shape index: {}]   ;;  %s176_s2 = inlined_call_operand.hbm [shape: f32[8,16], index: 2, kind: input, shape index: {}]   ;;  %s177_s3 = inlined_call_operand.hbm [shape: f32[8,16], index: 3, kind: output, shape index: {}]  }
   0x1   :  { %11 = vsyncpa [#allocation7], 0  ;;  %s21_s14 = sshll.u32 %s176_s2, 4  ;;  %s133_s15 = smov [#allocation5]   ;;  %s22_s14 = int_to_ptr.hbm [resolvable:$true] %s21_s14 }
   0x2   :  { %s23_s16 = sshll.u32 %s133_s15, 4  ;;  %s24_s16 = int_to_ptr.vmem [resolvable:$true] %s23_s16 }
   0x3   :  { %26 = dma.hbm_to_vmem [thread:$0]  %s22_s14, 128, %s24_s16, [#allocation6]  }
   0x4   :  { %129 = dma.done.wait [#allocation6], 128  }
   0x5   :  { %130 = vsyncadd [#allocation6], 4294967168  ;;  %v134_v0 = vmov 0.0   ;;  %vm33_vm0 = vcmask 130048   ;;  %v31_v1 = vld [vmem:[#allocation5] sm:$0xff]  ;;  %s135_s17 = smov 127   ;;  %v51_v8 = vstv %s174_s0  ;;  %v53_v9 = vstv %s175_s1 }
   0x6   :  { %32 = vst [vmem:[#allocation2] sm:$0xff] %v134_v0  ;;  %s136_s18 = smov 2   ;;  %s137_s2 = smov 126   ;;  %v52_v12 = vmul.f32 %v51_v8, %v31_v1  ;;  %v54_v13 = vmul.f32 %v53_v9, %v31_v1 }
   0x7   :  { %34 = vst.msk [vmem:[#allocation2] sm:$0xff] %vm33_vm0, %v31_v1  ;;  %s138_s19 = smov 1   ;;  %s139_s24 = smov [#allocation8]  }
   0x8   :  { %s62_s25 = sshll.u32 %s139_s24, 4  ;;  %s64_s28 = sshll.u32 %s177_s3, 4  ;;  %s63_s25 = int_to_ptr.vmem [resolvable:$true] %s62_s25  ;;  %s65_s28 = int_to_ptr.hbm [resolvable:$true] %s64_s28 }
   0xe   :  { %v35_v2 = vld [vmem:[#allocation2] sm:$0xff] }
   0xf   :  { %38 = vrot.lane.b32.xlu0 %v35_v2, %s135_s17  ;;  %36 = vrot.lane.b32.xlu1 %v35_v2, %s136_s18 }
  0x81   :  { %v39_v3 = vpop.permute.xlu0 %38  ;;  %v37_v7 = vpop.permute.xlu1 %36 }
  0x82   :  { %v40_v4 = vadd.f32 %v39_v3, %v35_v2 }
  0x84   :  { %41 = vrot.lane.b32.xlu0 %v40_v4, %s137_s2 }
  0xf6   :  { %v42_v5 = vpop.permute.xlu0 %41 }
  0xf7   :  { %v43_v6 = vadd.f32 %v42_v5, %v40_v4 }
  0xf9   :  { %44 = vrot.lane.b32.xlu1 %v43_v6, %s138_s19 }
 0x16b   :  { %v45_v10 = vpop.permute.xlu1 %44 }
 0x16c   :  { %v46_v11 = vadd.f32 %v45_v10, %v37_v7 }
 0x16e   :  { %v47_v14 = vmul.f32 0.2, %v46_v11 }
 0x170   :  { %vm50_vm1 = vcmp.gt.f32.partialorder %v31_v1, %v47_v14 }
 0x171   :  { %v55_v15 = vsel %vm50_vm1, %v52_v12, %v54_v13 }
 0x172   :  { %56 = vst.msk [vmem:[#allocation8] sm:$0xff] %vm33_vm0, %v55_v15 }
 0x173   :  { %67 = dma.vmem_to_hbm [thread:$0]  %s63_s25, 128, %s65_s28, [#allocation7]  }
 0x174   :  { %131 = dma.done.wait [#allocation7], 128  }
 0x175   :  { %132 = vsyncadd [#allocation7], 4294967168 }
 0x176   :  { %72 = vsyncpa [#allocation6], 1 }
 0x177   :  { %73 = vsyncpa [#allocation7], 1 }

</bundles_post_ra>
